<compile_context>
chip_gen: v6e
topology: v6e:2x2x1
jax: 0.10.0
libtpu: 0.0.40
codegen_flags: <defaults>
</compile_context>

<pallas_src>
import functools

import jax
import jax.numpy as jnp
from jax.experimental import pallas as pl
from jax.experimental.pallas import tpu as pltpu


def _sublane_align(dtype):
    """Rows per packed sublane group for this dtype (f32->8, bf16->16, i8->32)."""
    itemsize = jnp.dtype(dtype).itemsize
    return max(8, 32 // max(1, itemsize))


def _pick_block_rows(b, c, dtype, budget_bytes=8 * 1024 * 1024):
    """Batch-tile height: ~8 MiB of logits per tile, sublane-aligned, no row cap."""
    align = _sublane_align(dtype)
    itemsize = jnp.dtype(dtype).itemsize
    rows = budget_bytes // max(1, c * itemsize)
    rows = max(align, (rows // align) * align)
    return rows


def _lsr_ce_kernel(pre_ref, label_ref, out_ref, *, para_lsr, total_b,
                   block_rows, n_inner, compute_dtype):
    # pre_ref:   (TB, C) logits (streamed in their native dtype)
    # label_ref: (TB, 1) i32 class indices
    # out_ref:   (8, 128) f32 partial-sum slab for this outer (core) slice
    o = pl.program_id(0)
    i = pl.program_id(1)

    @pl.when(i == 0)
    def _():
        out_ref[...] = jnp.zeros_like(out_ref)

    x = pre_ref[...]
    if x.dtype != compute_dtype:
        x = x.astype(compute_dtype)
    tb, c = x.shape
    lbl = label_ref[...]                                     # (TB, 1) i32

    # Stable logsumexp pieces along the class (lane) axis.  max / subtract stay
    # in compute_dtype (packed bf16 when enabled); exp-sum / lse / accumulator
    # are always f32.
    m = jnp.max(x, axis=-1, keepdims=True)                   # (TB, 1)
    shifted = x - m                                          # (TB, C)
    lse = jnp.log(jnp.sum(jnp.exp(shifted).astype(jnp.float32),
                          axis=-1, keepdims=True))           # (TB, 1) f32

    # Fused smoothing reduction (single (TB, C) pass):
    #   loss_row = lse - sum_j w_j * shifted_j,   w_j = eps/C + (1-eps)[j==tgt]
    # (sum_j w_j == 1, so the lse term needs no weighting).
    base_prob = para_lsr / c
    cls_iota = jax.lax.broadcasted_iota(jnp.int32, (1, c), 1)  # (1, C) lane iota
    hit = cls_iota == lbl                                      # (TB, C) bool
    w = jnp.where(hit, base_prob + (1.0 - para_lsr),
                  base_prob).astype(compute_dtype)
    weighted = jnp.sum((w * shifted).astype(jnp.float32),
                       axis=-1, keepdims=True)                 # (TB, 1) f32

    per_row = lse - weighted                                   # (TB, 1) f32

    # Mask padded tail rows BEFORE the cross-row sum: garbage rows of a partial
    # last block may legitimately produce inf/NaN per_row values.
    row0 = (o * n_inner + i) * block_rows
    row_idx = row0 + jax.lax.broadcasted_iota(jnp.int32, (tb, 1), 0)
    per_row = jnp.where(row_idx < total_b, per_row, 0.0)

    # Broadcast-accumulate into the lane-dense partial-sum slab.
    out_ref[...] += jnp.sum(per_row)


def cross_entropy_loss_lsr(pre, label, para_lsr=0.2, size_average=True,
                           block_rows=None, num_core_splits=None,
                           low_precision_compute=False):
    """JAX/Pallas equivalent of CrossEntropyLoss_LSR.forward (weight=None)."""
    b, c = pre.shape
    label2d = label.astype(jnp.int32).reshape(b, 1)

    # --- Batch tile height: budget-driven, sublane-aligned, or full batch. ---
    if block_rows is None:
        block_rows = _pick_block_rows(b, c, pre.dtype)
    align = _sublane_align(pre.dtype)
    if block_rows >= b:
        tb = b                                   # single full-height block
    else:
        tb = max(align, (block_rows // align) * align)
        tb = b if tb >= b else tb
    n_tiles = pl.cdiv(b, tb)

    # --- Outer core split: default 1 (v5e/v6e single-TC); pass 2 on v7x. -----
    if num_core_splits is None:
        num_core_splits = 1
    n_outer = num_core_splits if (num_core_splits >= 1
                                  and n_tiles % num_core_splits == 0) else 1
    n_inner = n_tiles // n_outer

    compute_dtype = (jnp.bfloat16
                     if (low_precision_compute and pre.dtype == jnp.bfloat16)
                     else jnp.float32)

    kernel = functools.partial(
        _lsr_ce_kernel,
        para_lsr=float(para_lsr),
        total_b=int(b),
        block_rows=int(tb),
        n_inner=int(n_inner),
        compute_dtype=compute_dtype,
    )

    itemsize = jnp.dtype(pre.dtype).itemsize
    cost = pl.CostEstimate(
        flops=int(5 * b * c),
        transcendentals=int(b * c + b),                 # exp per elem + log per row
        bytes_accessed=int(b * c * itemsize + b * 4 + n_outer * 8 * 128 * 4),
    )

    # Deeper pipelining on the logits stream when the inner grid is long enough.
    want_buffers = 3 if n_inner >= 3 else 2

    # Raise the scoped-VMEM limit so ~8 MiB tiles (x buffering) fit on v5e's
    # 16 MiB default; bounded by 64 MiB (v7x physical VMEM per TC).
    vmem_needed = (want_buffers * tb * c * itemsize     # logit tiles
                   + 2 * tb * 4                         # label tiles
                   + 2 * 8 * 128 * 4                    # output slab
                   + (2 << 20))                         # compiler scratch margin
    vmem_limit = int(min(max(vmem_needed, 32 * 1024 * 1024), 64 * 1024 * 1024))

    ARB = getattr(pltpu, "ARBITRARY", "arbitrary")
    PAR = getattr(pltpu, "PARALLEL", "parallel")
    CORE_PAR = getattr(pltpu, "CORE_PARALLEL", PAR)

    def _logits_spec(n_buffers):
        idx = lambda o, i: (o * n_inner + i, 0)
        if n_buffers > 2 and hasattr(pl, "Buffered"):
            try:
                return pl.BlockSpec((tb, c), idx,
                                    pipeline_mode=pl.Buffered(n_buffers))
            except Exception:
                pass
        return pl.BlockSpec((tb, c), idx)

    def _run(n_buffers, outer_sem):
        return pl.pallas_call(
            kernel,
            out_shape=jax.ShapeDtypeStruct((8 * n_outer, 128), jnp.float32),
            grid_spec=pltpu.PrefetchScalarGridSpec(
                num_scalar_prefetch=0,
                grid=(n_outer, n_inner),
                in_specs=[
                    _logits_spec(n_buffers),
                    # Label block kept per-tile (tiny DMA; resident variant is a
                    # marginal win, see review) — accepted as-is.
                    pl.BlockSpec((tb, 1), lambda o, i: (o * n_inner + i, 0)),
                ],
                out_specs=pl.BlockSpec((8, 128), lambda o, i: (o, 0)),
            ),
            compiler_params=pltpu.CompilerParams(
                dimension_semantics=(outer_sem, ARB),
                vmem_limit_bytes=vmem_limit,
            ),
            cost_estimate=cost,
        )(pre, label2d)

    preferred_outer = CORE_PAR if n_outer > 1 else ARB
    fallback_outer = PAR if n_outer > 1 else ARB
    try:
        # Preferred config: deep buffering + core-parallel outer axis (v7x).
        partials = _run(want_buffers, preferred_outer)
    except Exception:
        # Conservative retry: default double-buffering, plain parallel outer.
        partials = _run(2, fallback_outer)

    # Each (8,128) slab holds one replicated per-slice partial sum.
    total = jnp.sum(partials[::8, 0])
    if size_average:
        return total / b
    return total


def _reference(pre, label, para_lsr=0.2, size_average=True):
    b, c = pre.shape
    logp = jax.nn.log_softmax(pre.astype(jnp.float32), axis=-1)
    base = para_lsr / c
    one_hot = jnp.full((b, c), base, jnp.float32)
    one_hot = one_hot.at[jnp.arange(b), label].add(1.0 - para_lsr)
    loss = jnp.sum(-one_hot * logp, axis=1)
    return jnp.mean(loss) if size_average else jnp.sum(loss)


if __name__ == "__main__":
    key = jax.random.PRNGKey(0)
    k1, k2, k3, k4 = jax.random.split(key, 4)

    # Test 1: batch-tiled (TB=8 -> 4 tiles), 3-deep buffered pipeline, mean loss.
    B1, C1 = 32, 16
    pre1 = jax.random.normal(k1, (B1, C1), dtype=jnp.float32)
    lab1 = jax.random.randint(k2, (B1,), 0, C1, dtype=jnp.int32)
    out1 = cross_entropy_loss_lsr(pre1, lab1, para_lsr=0.2, size_average=True,
                                  block_rows=8)
    jax.block_until_ready(out1)
    ref1 = _reference(pre1, lab1, 0.2, True)
    assert jnp.allclose(out1, ref1, atol=1e-5, rtol=1e-5), (out1, ref1)

    # Test 2: ragged tail (B=20 not a multiple of TB=8), sum reduction.
    B2, C2 = 20, 16
    pre2 = jax.random.normal(k3, (B2, C2), dtype=jnp.float32)
    lab2 = jax.random.randint(k4, (B2,), 0, C2, dtype=jnp.int32)
    out2 = cross_entropy_loss_lsr(pre2, lab2, para_lsr=0.3, size_average=False,
                                  block_rows=8)
    jax.block_until_ready(out2)
    ref2 = _reference(pre2, lab2, 0.3, False)
    assert jnp.allclose(out2, ref2, atol=1e-4, rtol=1e-5), (out2, ref2)

    # Test 3: bf16 logits streamed as bf16, f32 in-kernel compute (default).
    pre3 = pre1.astype(jnp.bfloat16)
    out3 = cross_entropy_loss_lsr(pre3, lab1, para_lsr=0.2, size_average=True,
                                  block_rows=16)
    jax.block_until_ready(out3)
    ref3 = _reference(pre3.astype(jnp.float32), lab1, 0.2, True)
    assert jnp.allclose(out3, ref3, atol=1e-4, rtol=1e-4), (out3, ref3)

    # Test 4: default tile-size path (single full-height block).
    B4, C4 = 8, 16
    pre4 = jax.random.normal(k1, (B4, C4), dtype=jnp.float32)
    lab4 = jax.random.randint(k2, (B4,), 0, C4, dtype=jnp.int32)
    out4 = cross_entropy_loss_lsr(pre4, lab4, para_lsr=0.2, size_average=True)
    jax.block_until_ready(out4)
    ref4 = _reference(pre4, lab4, 0.2, True)
    assert jnp.allclose(out4, ref4, atol=1e-5, rtol=1e-5), (out4, ref4)

    # Test 5: explicit 2-way outer core split (v7x megacore path; falls back
    # to plain parallel semantics on single-TC chips).
    out5 = cross_entropy_loss_lsr(pre1, lab1, para_lsr=0.2, size_average=True,
                                  block_rows=8, num_core_splits=2)
    jax.block_until_ready(out5)
    assert jnp.allclose(out5, ref1, atol=1e-5, rtol=1e-5), (out5, ref1)

    # Test 6: bf16 logits with packed-bf16 in-kernel compute (f32 accumulation).
    out6 = cross_entropy_loss_lsr(pre3, lab1, para_lsr=0.2, size_average=True,
                                  block_rows=16, low_precision_compute=True)
    jax.block_until_ready(out6)
    assert jnp.allclose(out6, ref3, atol=5e-2), (out6, ref3)

    print("KERNEL_OK")
</pallas_src>

<mosaic_0001>
module attributes {stable_mosaic.version = 11 : i64} {
  func.func @_lsr_ce_kernel(%arg0: i32, %arg1: i32, %arg2: memref<8x16xf32, #tpu.memory_space<vmem>>, %arg3: memref<8x1xi32, #tpu.memory_space<vmem>>, %arg4: memref<8x128xf32, #tpu.memory_space<vmem>>) attributes {dimension_semantics = [#tpu.dimension_semantics<arbitrary>, #tpu.dimension_semantics<arbitrary>], iteration_bounds = array<i64: 1, 4>, scalar_prefetch = 0 : i64, scratch_operands = 0 : i64, tpu.core_type = #tpu.core_type<tc>, window_params = [{transform_indices = @transform_0, window_bounds = array<i64: 8, 16>}, {transform_indices = @transform_1, window_bounds = array<i64: 8, 1>}, {transform_indices = @transform_2, window_bounds = array<i64: 8, 128>}]} {
    %c0_i32 = arith.constant 0 : i32
    %0 = arith.cmpi eq, %arg1, %c0_i32 : i32
    %1 = arith.extui %0 : i1 to i32
    %c0_i32_0 = arith.constant 0 : i32
    %2 = arith.cmpi ne, %1, %c0_i32_0 : i32
    scf.if %2 {
      %cst_14 = arith.constant 0.000000e+00 : f32
      %42 = vector.broadcast %cst_14 : f32 to vector<8x128xf32>
      %c0_15 = arith.constant 0 : index
      %c0_16 = arith.constant 0 : index
      %43 = vector.load %arg4[%c0_15, %c0_16] : memref<8x128xf32, #tpu.memory_space<vmem>>, vector<8x128xf32>
      tpu.vector_store %arg4[%c0_15, %c0_16], %42 {strides = array<i32>} : memref<8x128xf32, #tpu.memory_space<vmem>>, vector<8x128xf32>,
    } else {
    }
    %c0 = arith.constant 0 : index
    %c0_1 = arith.constant 0 : index
    %3 = vector.load %arg2[%c0, %c0_1] : memref<8x16xf32, #tpu.memory_space<vmem>>, vector<8x16xf32>
    %c0_2 = arith.constant 0 : index
    %c0_3 = arith.constant 0 : index
    %4 = vector.load %arg3[%c0_2, %c0_3] : memref<8x1xi32, #tpu.memory_space<vmem>>, vector<8x1xi32>
    %cst = arith.constant dense<0xFF800000> : vector<8xf32>
    %5 = vector.multi_reduction <maximumf>, %3, %cst [1] : vector<8x16xf32> to vector<8xf32>
    %6 = vector.shape_cast %5 : vector<8xf32> to vector<8x1xf32>
    %7 = vector.broadcast %6 : vector<8x1xf32> to vector<8x16xf32>
    %8 = arith.subf %3, %7 : vector<8x16xf32>
    %9 = math.exp %8 : vector<8x16xf32>
    %cst_4 = arith.constant dense<0.000000e+00> : vector<8xf32>
    %10 = vector.multi_reduction <add>, %9, %cst_4 [1] : vector<8x16xf32> to vector<8xf32>
    %11 = vector.shape_cast %10 : vector<8xf32> to vector<8x1xf32>
    %12 = math.log %11 : vector<8x1xf32>
    %13 = tpu.iota {dimensions = array<i32: 1>} : vector<1x16xi32>
    %14 = vector.broadcast %13 : vector<1x16xi32> to vector<8x16xi32>
    %15 = vector.broadcast %4 : vector<8x1xi32> to vector<8x16xi32>
    %16 = arith.cmpi eq, %14, %15 : vector<8x16xi32>
    %cst_5 = arith.constant 8.125000e-01 : f32
    %cst_6 = arith.constant 1.250000e-02 : f32
    %17 = vector.broadcast %cst_5 : f32 to vector<8x16xf32>
    %18 = vector.broadcast %cst_6 : f32 to vector<8x16xf32>
    %19 = arith.select %16, %17, %18 : vector<8x16xi1>, vector<8x16xf32>
    %20 = arith.mulf %19, %8 : vector<8x16xf32>
    %cst_7 = arith.constant dense<0.000000e+00> : vector<8xf32>
    %21 = vector.multi_reduction <add>, %20, %cst_7 [1] : vector<8x16xf32> to vector<8xf32>
    %22 = vector.shape_cast %21 : vector<8xf32> to vector<8x1xf32>
    %23 = arith.subf %12, %22 : vector<8x1xf32>
    %c4_i32 = arith.constant 4 : i32
    %24 = arith.muli %arg0, %c4_i32 : i32
    %25 = arith.addi %24, %arg1 : i32
    %c8_i32 = arith.constant 8 : i32
    %26 = arith.muli %25, %c8_i32 : i32
    %27 = tpu.iota {dimensions = array<i32: 0>} : vector<8x1xi32>
    %28 = vector.broadcast %26 : i32 to vector<8x1xi32>
    %29 = arith.addi %28, %27 : vector<8x1xi32>
    %c32_i32 = arith.constant 32 : i32
    %30 = vector.broadcast %c32_i32 : i32 to vector<8x1xi32>
    %31 = arith.cmpi slt, %29, %30 : vector<8x1xi32>
    %cst_8 = arith.constant 0.000000e+00 : f32
    %32 = vector.broadcast %cst_8 : f32 to vector<8x1xf32>
    %33 = arith.select %31, %23, %32 : vector<8x1xi1>, vector<8x1xf32>
    %c0_9 = arith.constant 0 : index
    %c0_10 = arith.constant 0 : index
    %34 = vector.load %arg4[%c0_9, %c0_10] : memref<8x128xf32, #tpu.memory_space<vmem>>, vector<8x128xf32>
    %35 = vector.shape_cast %33 : vector<8x1xf32> to vector<1x8x1xf32>
    %cst_11 = arith.constant dense<0.000000e+00> : vector<1xf32>
    %36 = vector.multi_reduction <add>, %35, %cst_11 [1, 2] : vector<1x8x1xf32> to vector<1xf32>
    %37 = vector.shape_cast %36 : vector<1xf32> to vector<1x1x1xf32>
    %38 = vector.extract %37[0, 0, 0] : f32 from vector<1x1x1xf32>
    %39 = vector.broadcast %38 : f32 to vector<8x128xf32>
    %40 = arith.addf %34, %39 : vector<8x128xf32>
    %c0_12 = arith.constant 0 : index
    %c0_13 = arith.constant 0 : index
    %41 = vector.load %arg4[%c0_12, %c0_13] : memref<8x128xf32, #tpu.memory_space<vmem>>, vector<8x128xf32>
    tpu.vector_store %arg4[%c0_12, %c0_13], %40 {strides = array<i32>} : memref<8x128xf32, #tpu.memory_space<vmem>>, vector<8x128xf32>,
    return
  }
  func.func @transform_0(%arg0: i32, %arg1: i32) -> (i32, i32) {
    %c4_i32 = arith.constant 4 : i32
    %0 = arith.muli %arg0, %c4_i32 : i32
    %1 = arith.addi %0, %arg1 : i32
    %c0_i32 = arith.constant 0 : i32
    %c0_i32_0 = arith.constant 0 : i32
    return %1, %c0_i32 : i32, i32
  }
  func.func @transform_1(%arg0: i32, %arg1: i32) -> (i32, i32) {
    %c4_i32 = arith.constant 4 : i32
    %0 = arith.muli %arg0, %c4_i32 : i32
    %1 = arith.addi %0, %arg1 : i32
    %c0_i32 = arith.constant 0 : i32
    %c0_i32_0 = arith.constant 0 : i32
    return %1, %c0_i32 : i32, i32
  }
  func.func @transform_2(%arg0: i32, %arg1: i32) -> (i32, i32) {
    %c0_i32 = arith.constant 0 : i32
    %c0_i32_0 = arith.constant 0 : i32
    return %arg0, %c0_i32 : i32, i32
  }
}

</mosaic_0001>

<bundles_post_ra>
// kernel: tpu_custom_call.1
= control target key start
LH: loop header
LB: loop body
LE: loop exit
PB: predicated region body
PF: predicated region fallthrough
CT: control target
= control target key end

     0   :  { %7 = vsyncpa [#allocation3], 0  ;;  %s439_s9 = smov 0   ;;  %s441_s10 = smov 0   ;;  %s499_s0 = inlined_call_operand.vmem [shape: f32[32,16], index: 0, kind: input, shape index: {}]   ;;  %s500_s1 = inlined_call_operand.vmem [shape: s32[32,1], index: 1, kind: input, shape index: {}]   ;;  %s501_s2 = inlined_call_operand.hbm [shape: f32[8,128], index: 2, kind: output, shape index: {}]  }
   0x1   :  { %s443_s11 = smov 0  }
   0x2 LB: > { %s315_s12 = sadd.s32 4294967295, %s418_s11   ;;  %s22_s13 = sadd.s32 1, %s414_s10  ;;  %s418_s11 = sphi %s443_s11, %s13_s11   ;;  %s414_s10 = sphi %s441_s10, %s504_s10   ;;  %s410_s9 = sphi %s439_s9, %s503_s9  }
   0x3   : > { %p23_p0 = scmp.ge.s32.totalorder %s22_s13, 4  ;;  %p318_p1 = scmp.ge.s32.totalorder %s418_s11, 1 }
   0x4   : > { %p149_p2 = scmp.lt.s32.totalorder %s418_s11, 5 }
   0x5   : > { %s506_s13 = smov (%p23_p0, %s22_s13), 0 }
   0x6   : > { %p150_p3 = pnand %p318_p1, %p149_p2 }
   0x7   : > { %p175_p4 = scmp.lt.s32.totalorder (!%p150_p3), %s410_s9, 3  ;;  %p321_p5 = scmp.ne.s32.totalorder (!%p150_p3), %s410_s9, 0 }
   0x8   : > { %153 = sbr.rel (%p150_p3) target bundleno = 546 (0x222), region = 28 }
   0xd   : > { %s176_s14 = scalar_select %p175_p4, %s410_s9, 3 }
   0xe   : > { %192 = sbr.rel (%p321_p5) target bundleno = 21 (0x15), region = 32 }
   0xf   : > { %s319_s15 = sshll.u32 %s176_s14, 3 }
  0x10   : > { %s178_s18 = scalar_lea.vmem %s499_s0, %s319_s15  ;;  %s186_s21 = scalar_lea.vmem %s500_s1, %s319_s15 }
  0x13   : > { %v420_v0 = vmov 0.0  }
  0x14   : > { %193 = vst [vmem:[#allocation2] sm:$0xff] %v420_v0 }
  0x15 PF: > { %v194_v1 = vld [vmem:[%s178_s18] sm:$0xff]  ;;  %vm196_vm0 = vcmask 130048   ;;  %v421_v3 = vmov 0   ;;  %v208_v8 = vlaneseq  ;;  %v422_v11 = vmov 0.0125   ;;  %s322_s22 = sshll.u32 %s410_s9, 3 }
  0x16   : > { %v197_v2 = vsel %vm196_vm0, %v194_v1, -inf  ;;  %363 = vset.pattern.permute.xlu0 %v421_v3  ;;  %v195_v4 = vld [vmem:[%s186_s21] sm:$0xff]  ;;  %v225_v19 = vstv %s322_s22  ;;  %vm230_vm3 = vcmask 7168   ;;  %s423_s23 = smov [#allocation2]   ;;  %p475_p6 = scmp.eq.s32.totalorder %s315_s12, 3 }
  0x17   : > { %198 = vmax.xlane.f32.xlu0 %v197_v2  ;;  %v209_v9 = vand.u32 127, %v208_v8  ;;  %v224_v18 = vshrl.u32 %v208_v8, 7  ;;  %s253_s24 = sshll.u32 %s423_s23, 4  ;;  %s254_s24 = int_to_ptr.vmem [resolvable:$true] %s253_s24 }
  0x18   : > { %s368_s27 = scalar_lea.vmem %s254_s24, 128  ;;  %p375_p10 = scmp.lt.s32.totalorder %s254_s24, %s254_s24 }
  0x19   : > { %v226_v20 = vadd.s32 %v225_v19, %v224_v18  ;;  %p369_p7 = scmp.ne.s32.totalorder %s254_s24, %s368_s27  ;;  %p376_p11 = scmp.lt.s32.totalorder %s368_s27, %s368_s27 }
  0x1b   : > { %vm227_vm2 = vcmp.lt.s32.totalorder %v226_v20, 32  ;;  %v229_v34 = vld [vmem:[#allocation2] sm:$0xff]  ;;  %p370_p8 = pnand %p369_p7, %p475_p6  ;;  %p377_p12 = por %p376_p11, %p375_p10 }
  0x1d   : > { %p371_p9 = pneg %p370_p8 }
  0x1f   : > { %p378_p13 = pnand %p377_p12, %p371_p9 }
  0x2d   : > { %211 = vperm.xlu0 %363, %v195_v4  }
  0xa0   : > { %v199_v5 = vpop.xlane.xlu0 %198 }
  0xa1   : > { %v200_v6 = vsub.f32 %v194_v1, %v199_v5 }
  0xa3   : > { %v201_v7 = vmul.f32 1.442695, %v200_v6 }
  0xa5   : > { %364 = vpow2.f32 %v201_v7 }
  0xa8   : > { %v212_v10 = vpop.permute.xlu0 %211 }
  0xa9   : > { %vm213_vm1 = vcmp.eq.s32.totalorder %v209_v9, %v212_v10 }
  0xaa   : > { %v214_v12 = vsel %vm213_vm1, 0.8125, %v422_v11 }
  0xab   : > { %v215_v15 = vmul.f32 %v214_v12, %v200_v6 }
  0xad   : > { %v216_v16 = vsel %vm196_vm0, %v215_v15, 0.0 }
  0xb2   : > { %v365_v13 = vpop.eup %364 }
  0xb3   : > { %v203_v14 = vsel %vm196_vm0, %v365_v13, 0.0 }
  0xb4   : > { %204 = vadd.xlane.f32.xlu1 %v203_v14 }
  0xb8   : > { %217 = vadd.xlane.f32.xlu1 %v216_v16 }
 0x13d   : > { %v205_v17 = vpop.xlane.xlu1 %204 }
 0x13e   : > { %366 = vlog2.f32 %v205_v17 }
 0x141   : > { %v218_v23 = vpop.xlane.xlu1 %217 }
 0x14b   : > { %v367_v21 = vpop.eup %366 }
 0x14c   : > { %v207_v22 = vmul.f32 0.6931472, %v367_v21 }
 0x14e   : > { %v219_v24 = vsub.f32 %v207_v22, %v218_v23 }
 0x150   : > { %v228_v25 = vsel %vm227_vm2, %v219_v24, 0.0 }
 0x151   : > { %v231_v26 = vsel %vm230_vm3, %v228_v25, 0.0 }
 0x152   : > { %232 = vadd.xlane.f32.xlu1 %v231_v26 }
 0x1db   : > { %v233_v27 = vpop.xlane.xlu1 %232 }
 0x1dc   : > { %v234_v28 = vrot.slane %v233_v27, 4 }
 0x1de   : > { %v235_v29 = vadd.f32 %v234_v28, %v233_v27 }
 0x1e0   : > { %v236_v30 = vrot.slane %v235_v29, 2 }
 0x1e2   : > { %v237_v31 = vadd.f32 %v236_v30, %v235_v29 }
 0x1e4   : > { %v238_v32 = vrot.slane %v237_v31, 1 }
 0x1e6   : > { %v239_v33 = vadd.f32 %v238_v32, %v237_v31 }
 0x1e8   : > { %327 = vpush %v239_v33 }
 0x219   : > { %s328_s25 = spop %327 }
 0x21a   : > { %v241_v35 = vstv %s328_s25 }
 0x21b   : > { %v242_v36 = vadd.f32 %v241_v35, %v229_v34 }
 0x21d   : > { %243 = vst [vmem:[#allocation2] sm:$0xff] %v242_v36 }
 0x21e   : > { %381 = shalt.err (!%p378_p13)
}
 0x21f   : > { %330 = dma.vmem_to_hbm [thread:$0]  (%p475_p6), %s254_s24, 128, %s501_s2, [#allocation3]  }
 0x220   : > { %405 = dma.done.wait (%p475_p6), [#allocation3], 128  }
 0x221   : > { %407 = vsyncadd (%p475_p6), [#allocation3], 4294967168 }
 0x222 PF: > { %s13_s11 = sadd.s32 1, %s418_s11   ;;  %s503_s9 = smov %s414_s10 }
 0x223   : > { %p10_p0 = scmp.ge.s32.totalorder %s13_s11, 6   ;;  %s504_s10 = smov %s506_s13 }
 0x225   :  { %12 = sbr.rel (!%p10_p0) target bundleno = 2 (0x2), region = 63 }
 0x22a   :  { %266 = vsyncpa [#allocation3], 1 }
 0x22b   :  { %268 = vsyncpa [#allocation3 + $0x1], 1 }

</bundles_post_ra>
